<compile_context>
chip_gen: v6e
topology: v6e:2x2x1
jax: 0.10.0
libtpu: 0.0.40
codegen_flags: <defaults>
</compile_context>

<pallas_src>
import jax
import jax.numpy as jnp
from jax.experimental import pallas as pl
from jax.experimental.pallas import tpu as pltpu


def _round_up(x, m):
    return (x + m - 1) // m * m


# ---------------------------------------------------------------------------
# Kernels
# ---------------------------------------------------------------------------
def _layerfc_kernel_inplace(x_ref, w_ref, p_ref, o_ref):
    """f32 output: o_ref doubles as the K-axis accumulator (block idx (i, j)
    is constant across k, so the tile stays resident in VMEM)."""
    k = pl.program_id(2)
    part = jnp.dot(x_ref[...].astype(jnp.bfloat16), w_ref[...],
                   preferred_element_type=jnp.float32)

    @pl.when(k == 0)
    def _():
        o_ref[...] = part                       # init with first dot (no zero-fill)

    @pl.when(k != 0)
    def _():
        o_ref[...] += part

    @pl.when(k == pl.num_programs(2) - 1)
    def _():
        bias = p_ref[0:1, :]
        scale = p_ref[1:2, :]
        shift = p_ref[2:3, :]
        h = jnp.maximum(o_ref[...] + bias, 0.0)                  # bias + ReLU
        o_ref[...] = h * scale + shift                           # BN (eval)


def _layerfc_kernel_acc(x_ref, w_ref, p_ref, o_ref, acc_ref):
    """Non-f32 output: accumulate in an f32 VMEM scratch, cast on the store."""
    k = pl.program_id(2)
    part = jnp.dot(x_ref[...].astype(jnp.bfloat16), w_ref[...],
                   preferred_element_type=jnp.float32)

    @pl.when(k == 0)
    def _():
        acc_ref[...] = part

    @pl.when(k != 0)
    def _():
        acc_ref[...] += part

    @pl.when(k == pl.num_programs(2) - 1)
    def _():
        bias = p_ref[0:1, :]
        scale = p_ref[1:2, :]
        shift = p_ref[2:3, :]
        h = jnp.maximum(acc_ref[...] + bias, 0.0)
        o_ref[...] = (h * scale + shift).astype(o_ref.dtype)


# ---------------------------------------------------------------------------
# One-time parameter preparation (hoisted out of the per-call path)
# ---------------------------------------------------------------------------
def prepare_layerfc_params(weight, bias, gamma, beta, running_mean, running_var,
                           eps=1e-5, tile_n=None, tile_k=None):
    """weight: (D_out, D_in) PyTorch layout.  Returns a dict of constants:
    pre-transposed / bf16 / padded weight and the packed (8, n_p) param slab."""
    D_out, D_in = weight.shape
    if tile_k is None:
        tile_k = min(2048, _round_up(D_in, 128))
    if tile_n is None:
        tile_n = min(512, _round_up(D_out, 128))
    assert tile_k % 128 == 0 and tile_n % 128 == 0
    k_p = _round_up(D_in, tile_k)
    n_p = _round_up(D_out, tile_n)

    # Fold eval-mode BatchNorm1d into per-feature scale/shift (cannot be folded
    # through the ReLU into W/b because gamma may be negative).
    scale = gamma / jnp.sqrt(running_var + eps)
    shift = beta - running_mean * scale

    w_p = jnp.zeros((k_p, n_p), jnp.bfloat16).at[:D_in, :D_out].set(
        weight.T.astype(jnp.bfloat16))

    params = jnp.zeros((8, n_p), jnp.float32)
    params = params.at[0, :D_out].set(bias.astype(jnp.float32))
    params = params.at[1, :D_out].set(scale.astype(jnp.float32))
    params = params.at[2, :D_out].set(shift.astype(jnp.float32))

    return dict(w=w_p, params=params, D_in=D_in, D_out=D_out,
                tile_n=tile_n, tile_k=tile_k)


# ---------------------------------------------------------------------------
# Forward
# ---------------------------------------------------------------------------
def layer_fc_forward(x, prepared, out_dtype=jnp.float32, tile_b=None):
    """x: (B, D_in) float.  Returns (B, D_out) in out_dtype."""
    B, D_in = x.shape
    assert D_in == prepared["D_in"], "input feature size mismatch"
    D_out = prepared["D_out"]
    w_p, params = prepared["w"], prepared["params"]
    tile_n, tile_k = prepared["tile_n"], prepared["tile_k"]
    k_p, n_p = w_p.shape

    # tile_b >= B (for B <= 512) so the weight streams from HBM exactly once.
    if tile_b is None:
        tile_b = min(512, _round_up(B, 16))
    assert tile_b % 16 == 0
    b_p = _round_up(B, tile_b)

    # v7x megacore: try to expose >= 2 steps on the parallel (M, N) sub-grid.
    grid_m, grid_n = b_p // tile_b, n_p // tile_n
    if grid_m * grid_n < 2:
        if B > 16 and tile_b >= 32:
            tile_b = _round_up(tile_b // 2, 16)
            b_p = _round_up(B, tile_b)
        elif tile_n >= 256 and (tile_n // 2) % 128 == 0 and n_p % (tile_n // 2) == 0:
            tile_n //= 2
        grid_m, grid_n = b_p // tile_b, n_p // tile_n
    grid_k = k_p // tile_k
    grid = (grid_m, grid_n, grid_k)

    # x feed: avoid pad/cast copies when possible.
    needs_pad = (b_p != B) or (k_p != D_in)
    if needs_pad:
        x_in = jnp.zeros((b_p, k_p), jnp.bfloat16).at[:B, :D_in].set(
            x.astype(jnp.bfloat16))
    elif grid_n > 1 and x.dtype != jnp.bfloat16:
        # x is re-read grid_n times from HBM -> one up-front cast halves bytes.
        x_in = x.astype(jnp.bfloat16)
    else:
        x_in = x                      # fed as-is, cast to bf16 inside the kernel
    x_itemsize = jnp.dtype(x_in.dtype).itemsize
    out_itemsize = jnp.dtype(out_dtype).itemsize

    inplace = jnp.dtype(out_dtype) == jnp.dtype(jnp.float32)
    kernel = _layerfc_kernel_inplace if inplace else _layerfc_kernel_acc
    scratch = [] if inplace else [pltpu.VMEM((tile_b, tile_n), jnp.float32)]

    # VMEM budget: double-buffered x/W/params/out (+ scratch acc), with headroom,
    # capped at 48 MiB so it also fits v7x's 64 MiB physical VMEM.
    vmem_est = (2 * tile_b * tile_k * x_itemsize
                + 2 * tile_k * tile_n * 2
                + 2 * 8 * tile_n * 4
                + 2 * tile_b * tile_n * out_itemsize
                + (0 if inplace else tile_b * tile_n * 4))
    vmem_limit = int(min(max(2 * vmem_est, 32 << 20), 48 << 20))

    cost = pl.CostEstimate(
        flops=2 * B * D_in * D_out,
        bytes_accessed=(x_in.size * x_itemsize * grid_n      # x re-read per N tile
                        + w_p.size * 2 * grid_m               # W re-read per M tile
                        + params.size * 4
                        + b_p * n_p * out_itemsize),
        transcendentals=0)

    out = pl.pallas_call(
        kernel,
        out_shape=jax.ShapeDtypeStruct((b_p, n_p), out_dtype),
        grid_spec=pltpu.PrefetchScalarGridSpec(
            num_scalar_prefetch=0,
            grid=grid,
            in_specs=[
                pl.BlockSpec((tile_b, tile_k), lambda i, j, k: (i, k)),  # x
                pl.BlockSpec((tile_k, tile_n), lambda i, j, k: (k, j)),  # W^T
                pl.BlockSpec((8, tile_n), lambda i, j, k: (0, j)),       # params
            ],
            out_specs=pl.BlockSpec((tile_b, tile_n), lambda i, j, k: (i, j)),
            scratch_shapes=scratch,
        ),
        compiler_params=pltpu.CompilerParams(
            dimension_semantics=("parallel", "parallel", "arbitrary"),
            vmem_limit_bytes=vmem_limit),
        cost_estimate=cost,
    )(x_in, w_p, params)

    if b_p == B and n_p == D_out:
        return out
    return out[:B, :D_out]


# ---------------------------------------------------------------------------
# Self-test
# ---------------------------------------------------------------------------
def _reference(x, weight, bias, gamma, beta, running_mean, running_var, eps=1e-5):
    # Same bf16 input rounding as the kernel (MXU operands), f32 math otherwise.
    x_c = x.astype(jnp.bfloat16).astype(jnp.float32)
    w_c = weight.astype(jnp.bfloat16).astype(jnp.float32)
    h = jnp.maximum(x_c @ w_c.T + bias, 0.0)
    return (h - running_mean) / jnp.sqrt(running_var + eps) * gamma + beta


def _run_case(key, B, D_in, D_out, tile_k=None):
    kx, kw, kb = jax.random.split(key, 3)
    x = jax.random.normal(kx, (B, D_in), dtype=jnp.float32)

    bound = 1.0 / (D_in ** 0.5)
    weight = jax.random.uniform(kw, (D_out, D_in), minval=-bound, maxval=bound,
                                dtype=jnp.float32)
    bias = jax.random.uniform(kb, (D_out,), minval=-bound, maxval=bound,
                              dtype=jnp.float32)
    gamma = jnp.ones((D_out,), jnp.float32)
    beta = jnp.zeros((D_out,), jnp.float32)
    running_mean = jnp.zeros((D_out,), jnp.float32)
    running_var = jnp.ones((D_out,), jnp.float32)

    prepared = prepare_layerfc_params(weight, bias, gamma, beta,
                                      running_mean, running_var,
                                      tile_k=tile_k)
    out = jax.block_until_ready(layer_fc_forward(x, prepared))

    ref = _reference(x, weight, bias, gamma, beta, running_mean, running_var)
    assert out.shape == (B, D_out)
    assert jnp.allclose(out, ref, atol=2e-3, rtol=2e-3), \
        f"mismatch: max abs err {jnp.max(jnp.abs(out - ref))}"


if __name__ == "__main__":
    key = jax.random.PRNGKey(0)
    k1, k2 = jax.random.split(key)

    # Small shape matching layerFC(input_dim=32, output_dim=64), batch of 8.
    _run_case(k1, B=8, D_in=32, D_out=64)

    # Slightly larger case exercising padding, the multi-K accumulate path
    # (tile_k forced to 128 -> 2 K steps) and the megacore tile_b split.
    _run_case(k2, B=24, D_in=256, D_out=192, tile_k=128)

    print("KERNEL_OK")
</pallas_src>

<mosaic_0001>
module attributes {stable_mosaic.version = 11 : i64} {
  func.func @_layerfc_kernel_inplace(%arg0: i32, %arg1: i32, %arg2: i32, %arg3: memref<16x128xbf16, #tpu.memory_space<vmem>>, %arg4: memref<128x128xbf16, #tpu.memory_space<vmem>>, %arg5: memref<8x128xf32, #tpu.memory_space<vmem>>, %arg6: memref<16x128xf32, #tpu.memory_space<vmem>>) attributes {dimension_semantics = [#tpu.dimension_semantics<parallel>, #tpu.dimension_semantics<parallel>, #tpu.dimension_semantics<arbitrary>], iteration_bounds = array<i64: 1, 1, 1>, scalar_prefetch = 0 : i64, scratch_operands = 0 : i64, tpu.core_type = #tpu.core_type<tc>, window_params = [{transform_indices = @transform_0, window_bounds = array<i64: 16, 128>}, {transform_indices = @transform_1, window_bounds = array<i64: 128, 128>}, {transform_indices = @transform_2, window_bounds = array<i64: 8, 128>}, {transform_indices = @transform_3, window_bounds = array<i64: 16, 128>}]} {
    %c0 = arith.constant 0 : index
    %c0_0 = arith.constant 0 : index
    %0 = vector.load %arg3[%c0, %c0_0] : memref<16x128xbf16, #tpu.memory_space<vmem>>, vector<16x128xbf16>
    %c0_1 = arith.constant 0 : index
    %c0_2 = arith.constant 0 : index
    %1 = vector.load %arg4[%c0_1, %c0_2] : memref<128x128xbf16, #tpu.memory_space<vmem>>, vector<128x128xbf16>
    %cst = arith.constant dense<0.000000e+00> : vector<16x128xf32>
    %2 = tpu.matmul %0, %1, %cst {dimension_numbers = #tpu.dot_dimension_numbers<[1], [0], [0], [1], [0, 0, 1, 1], [], []>} : vector<16x128xbf16>, vector<128x128xbf16>, vector<16x128xf32> -> vector<16x128xf32>
    %c0_i32 = arith.constant 0 : i32
    %3 = arith.cmpi eq, %arg2, %c0_i32 : i32
    %4 = arith.extui %3 : i1 to i32
    %c0_i32_3 = arith.constant 0 : i32
    %5 = arith.cmpi ne, %4, %c0_i32_3 : i32
    scf.if %5 {
      %c0_8 = arith.constant 0 : index
      %c0_9 = arith.constant 0 : index
      %12 = vector.load %arg6[%c0_8, %c0_9] : memref<16x128xf32, #tpu.memory_space<vmem>>, vector<16x128xf32>
      tpu.vector_store %arg6[%c0_8, %c0_9], %2 {strides = array<i32>} : memref<16x128xf32, #tpu.memory_space<vmem>>, vector<16x128xf32>,
    } else {
    }
    %c0_i32_4 = arith.constant 0 : i32
    %6 = arith.cmpi ne, %arg2, %c0_i32_4 : i32
    %7 = arith.extui %6 : i1 to i32
    %c0_i32_5 = arith.constant 0 : i32
    %8 = arith.cmpi ne, %7, %c0_i32_5 : i32
    scf.if %8 {
      %c0_8 = arith.constant 0 : index
      %c0_9 = arith.constant 0 : index
      %12 = vector.load %arg6[%c0_8, %c0_9] : memref<16x128xf32, #tpu.memory_space<vmem>>, vector<16x128xf32>
      %13 = arith.addf %12, %2 : vector<16x128xf32>
      %c0_10 = arith.constant 0 : index
      %c0_11 = arith.constant 0 : index
      %14 = vector.load %arg6[%c0_10, %c0_11] : memref<16x128xf32, #tpu.memory_space<vmem>>, vector<16x128xf32>
      tpu.vector_store %arg6[%c0_10, %c0_11], %13 {strides = array<i32>} : memref<16x128xf32, #tpu.memory_space<vmem>>, vector<16x128xf32>,
    } else {
    }
    %c0_i32_6 = arith.constant 0 : i32
    %9 = arith.cmpi eq, %arg2, %c0_i32_6 : i32
    %10 = arith.extui %9 : i1 to i32
    %c0_i32_7 = arith.constant 0 : i32
    %11 = arith.cmpi ne, %10, %c0_i32_7 : i32
    scf.if %11 {
      %c0_8 = arith.constant 0 : index
      %c0_9 = arith.constant 0 : index
      %12 = vector.load %arg5[%c0_8, %c0_9] : memref<8x128xf32, #tpu.memory_space<vmem>>, vector<1x128xf32>
      %c1 = arith.constant 1 : index
      %c0_10 = arith.constant 0 : index
      %13 = vector.load %arg5[%c1, %c0_10] : memref<8x128xf32, #tpu.memory_space<vmem>>, vector<1x128xf32>
      %c2 = arith.constant 2 : index
      %c0_11 = arith.constant 0 : index
      %14 = vector.load %arg5[%c2, %c0_11] : memref<8x128xf32, #tpu.memory_space<vmem>>, vector<1x128xf32>
      %c0_12 = arith.constant 0 : index
      %c0_13 = arith.constant 0 : index
      %15 = vector.load %arg6[%c0_12, %c0_13] : memref<16x128xf32, #tpu.memory_space<vmem>>, vector<16x128xf32>
      %16 = vector.broadcast %12 : vector<1x128xf32> to vector<16x128xf32>
      %17 = arith.addf %15, %16 : vector<16x128xf32>
      %cst_14 = arith.constant 0.000000e+00 : f32
      %18 = vector.broadcast %cst_14 : f32 to vector<16x128xf32>
      %19 = arith.maximumf %17, %18 : vector<16x128xf32>
      %20 = vector.broadcast %13 : vector<1x128xf32> to vector<16x128xf32>
      %21 = arith.mulf %19, %20 : vector<16x128xf32>
      %22 = vector.broadcast %14 : vector<1x128xf32> to vector<16x128xf32>
      %23 = arith.addf %21, %22 : vector<16x128xf32>
      %c0_15 = arith.constant 0 : index
      %c0_16 = arith.constant 0 : index
      %24 = vector.load %arg6[%c0_15, %c0_16] : memref<16x128xf32, #tpu.memory_space<vmem>>, vector<16x128xf32>
      tpu.vector_store %arg6[%c0_15, %c0_16], %23 {strides = array<i32>} : memref<16x128xf32, #tpu.memory_space<vmem>>, vector<16x128xf32>,
    } else {
    }
    return
  }
  func.func @transform_0(%arg0: i32, %arg1: i32, %arg2: i32) -> (i32, i32) {
    %c0_i32 = arith.constant 0 : i32
    return %arg0, %arg2 : i32, i32
  }
  func.func @transform_1(%arg0: i32, %arg1: i32, %arg2: i32) -> (i32, i32) {
    %c0_i32 = arith.constant 0 : i32
    return %arg2, %arg1 : i32, i32
  }
  func.func @transform_2(%arg0: i32, %arg1: i32, %arg2: i32) -> (i32, i32) {
    %c0_i32 = arith.constant 0 : i32
    %c0_i32_0 = arith.constant 0 : i32
    return %c0_i32, %arg1 : i32, i32
  }
  func.func @transform_3(%arg0: i32, %arg1: i32, %arg2: i32) -> (i32, i32) {
    %c0_i32 = arith.constant 0 : i32
    return %arg0, %arg1 : i32, i32
  }
}

</mosaic_0001>

<bundles_post_ra>
// kernel: tpu_custom_call.1
= control target key start
LH: loop header
LB: loop body
LE: loop exit
PB: predicated region body
PF: predicated region fallthrough
CT: control target
= control target key end

     0   :  { %8 = vsyncpa [#allocation3], 0  ;;  %s420_s0 = inlined_call_operand.hbm [shape: bf16[16,128], index: 0, kind: input, shape index: {}]   ;;  %s421_s1 = inlined_call_operand.hbm [shape: bf16[128,128], index: 1, kind: input, shape index: {}]   ;;  %s422_s2 = inlined_call_operand.hbm [shape: f32[8,128], index: 2, kind: input, shape index: {}]   ;;  %s423_s3 = inlined_call_operand.hbm [shape: f32[16,128], index: 3, kind: output, shape index: {}]  }
   0x1   :  { %9 = vsyncpa [#allocation6], 0 }
   0x2   :  { %10 = vsyncpa [#allocation4], 0  ;;  %s378_s12 = smov [#allocation5]   ;;  %s379_s14 = smov [#allocation2]  }
   0x3   :  { %s28_s13 = sshll.u32 %s378_s12, 4  ;;  %s16_s15 = sshll.u32 %s379_s14, 4  ;;  %s29_s13 = int_to_ptr.vmem [resolvable:$true] %s28_s13  ;;  %s17_s15 = int_to_ptr.vmem [resolvable:$true] %s16_s15 }
   0x4   :  { %s300_s16 = scalar_lea.vmem %s29_s13, 1024  ;;  %p305_p1 = scmp.lt.s32.totalorder %s29_s13, %s29_s13 }
   0x5   :  { %p301_p0 = scmp.ne.s32.totalorder %s29_s13, %s300_s16  ;;  %p306_p2 = scmp.lt.s32.totalorder %s300_s16, %s300_s16 }
   0x7   :  { %p307_p3 = por %p306_p2, %p305_p1 }
   0x9   :  { %p308_p4 = pnand %p307_p3, %p301_p0 }
   0xb   :  { %311 = shalt.err (!%p308_p4)
}
   0xc   :  { %s380_s17 = smov 64   ;;  %s381_s18 = smov 4  }
   0xd   :  { %34 = dma.hbm_to_vmem [thread:$0]  %s421_s1, 1024, %s29_s13, [#allocation6], %s380_s17, %s380_s17, %s381_s18  }
   0xe   :  { %s320_s21 = scalar_lea.vmem %s17_s15, 128  ;;  %p325_p6 = scmp.lt.s32.totalorder %s17_s15, %s17_s15 }
   0xf   :  { %p321_p5 = scmp.ne.s32.totalorder %s17_s15, %s320_s21  ;;  %p326_p7 = scmp.lt.s32.totalorder %s320_s21, %s320_s21 }
  0x11   :  { %p327_p8 = por %p326_p7, %p325_p6 }
  0x13   :  { %p328_p9 = pnand %p327_p8, %p321_p5 }
  0x15   :  { %331 = shalt.err (!%p328_p9)
}
  0x16   :  { %22 = dma.hbm_to_vmem [thread:$0]  %s420_s0, 128, %s17_s15, [#allocation3], %s380_s17, %s380_s17, %s381_s18  }
  0x17   :  { %s382_s24 = smov [#allocation7]  }
  0x18   :  { %s41_s25 = sshll.u32 %s382_s24, 4  ;;  %s42_s25 = int_to_ptr.vmem [resolvable:$true] %s41_s25 }
  0x19   :  { %s340_s26 = scalar_lea.vmem %s42_s25, 128  ;;  %p345_p11 = scmp.lt.s32.totalorder %s42_s25, %s42_s25 }
  0x1a   :  { %p341_p10 = scmp.ne.s32.totalorder %s42_s25, %s340_s26  ;;  %p346_p12 = scmp.lt.s32.totalorder %s340_s26, %s340_s26 }
  0x1c   :  { %p347_p13 = por %p346_p12, %p345_p11 }
  0x1e   :  { %p348_p0 = pnand %p347_p13, %p341_p10 }
  0x20   :  { %351 = shalt.err (!%p348_p0)
}
  0x21   :  { %44 = dma.hbm_to_vmem [thread:$0]  %s422_s2, 128, %s42_s25, [#allocation6]  }
  0x22   :  { %372 = dma.done.wait [#allocation3], 128  }
  0x23   :  { %373 = vsyncadd [#allocation3], 4294967168 }
  0x24   :  { %374 = dma.done.wait [#allocation6], 1152  }
  0x25   :  { %375 = vsyncadd [#allocation6], 4294966144  ;;  %v383_v0 = vmov 0.0   ;;  %vm384_vm0 = vmmov 0   ;;  %v283_v1 = vld [vmem:[#allocation5 + $0x38] sm:$0xff]   ;;  %v284_v2 = vld [vmem:[#allocation5 + $0x30] sm:$0xff]  }
  0x26   :  { %253 = vmatprep.subr.bf16.mxu0 %v383_v0  ;;  %269 = vmatprep.mubr.msk.bf16.mxu0 %vm384_vm0, %v383_v0  ;;  %v285_v3 = vld [vmem:[#allocation5 + $0x28] sm:$0xff]   ;;  %v286_v4 = vld [vmem:[#allocation5 + $0x20] sm:$0xff]   ;;  %v287_v5 = vld [vmem:[#allocation5 + $0x18] sm:$0xff]   ;;  %s385_s0 = smov [#allocation8]  }
  0x27   :  { %254 = vmatpush3.bf16.msra.mxu0 %v283_v1  ;;  %v288_v6 = vld [vmem:[#allocation5 + $0x10] sm:$0xff]   ;;  %v289_v7 = vld [vmem:[#allocation5 + $0x8] sm:$0xff]   ;;  %v290_v8 = vld [vmem:[#allocation5] sm:$0xff]   ;;  %s219_s2 = sshll.u32 %s385_s0, 4  ;;  %s220_s2 = int_to_ptr.vmem [resolvable:$true] %s219_s2 }
  0x28   :  { %255 = vmatprep.subr.bf16.mxu0 %v383_v0  ;;  %v291_v9 = vld [vmem:[#allocation2] sm:$0xff]   ;;  %v241_v10 = vld [vmem:[#allocation7] ss:$0 sm:$0xff]  ;;  %v242_v13 = vld [vmem:[#allocation7 + $0x1] ss:$0 sm:$0xff]  ;;  %s352_s28 = scalar_lea.vmem %s220_s2, 256  ;;  %p357_p2 = scmp.lt.s32.totalorder %s220_s2, %s220_s2 }
  0x29   :  { %v243_v16 = vld [vmem:[#allocation7 + $0x2] ss:$0 sm:$0xff]  ;;  %p353_p1 = scmp.ne.s32.totalorder %s220_s2, %s352_s28  ;;  %p358_p3 = scmp.lt.s32.totalorder %s352_s28, %s352_s28 }
  0x2b   :  { %256 = vmatpush3.bf16.msra.mxu0 %v284_v2  ;;  %p359_p4 = por %p358_p3, %p357_p2 }
  0x2c   :  { %257 = vmatprep.subr.bf16.mxu0 %v383_v0 }
  0x2d   :  { %p360_p5 = pnand %p359_p4, %p353_p1 }
  0x2f   :  { %258 = vmatpush3.bf16.msra.mxu0 %v285_v3 }
  0x30   :  { %259 = vmatprep.subr.bf16.mxu0 %v383_v0 }
  0x33   :  { %260 = vmatpush3.bf16.msra.mxu0 %v286_v4 }
  0x34   :  { %261 = vmatprep.subr.bf16.mxu0 %v383_v0 }
  0x37   :  { %262 = vmatpush3.bf16.msra.mxu0 %v287_v5 }
  0x38   :  { %263 = vmatprep.subr.bf16.mxu0 %v383_v0 }
  0x3b   :  { %264 = vmatpush3.bf16.msra.mxu0 %v288_v6 }
  0x3c   :  { %265 = vmatprep.subr.bf16.mxu0 %v383_v0 }
  0x3f   :  { %266 = vmatpush3.bf16.msra.mxu0 %v289_v7 }
  0x40   :  { %267 = vmatprep.subr.bf16.mxu0 %v383_v0 }
  0x43   :  { %268 = vmatpush3.bf16.msra.mxu0 %v290_v8 }
  0x46   :  { %270 = vmatmul.mubr.bf16.vlgmr.msra.gmra.mxu0 %v291_v9 }
 0x106   :  { %v161_v11 = vpop.f32.mrf.mxu0 }
 0x107   :  { %v196_v12 = vadd.f32 %v241_v10, %v161_v11 }
 0x108   :  { %v271_v14 = vpop.f32.mrf.mxu0 }
 0x109   :  { %v198_v15 = vmax.f32 %v196_v12, 0.0 }
 0x10a   :  { %v164_v17 = vpop.f32.mrf.mxu0 }
 0x10b   :  { %v204_v18 = vmul.f32 %v242_v13, %v198_v15  ;;  %v197_v19 = vadd.f32 %v241_v10, %v164_v17 }
 0x10c   :  { %v272_v20 = vpop.f32.mrf.mxu0 }
 0x10d   :  { %v210_v21 = vadd.f32 %v243_v16, %v204_v18  ;;  %v199_v22 = vmax.f32 %v197_v19, 0.0 }
 0x10f   :  { %212 = vst [vmem:[#allocation8] sm:$0xff] %v210_v21  ;;  %v205_v23 = vmul.f32 %v242_v13, %v199_v22 }
 0x111   :  { %v211_v24 = vadd.f32 %v243_v16, %v205_v23 }
 0x113   :  { %213 = vst [vmem:[#allocation8 + $0x8] sm:$0xff] %v211_v24 }
 0x114   :  { %363 = shalt.err (!%p360_p5)
}
 0x115   :  { %s386_s29 = smov 128   ;;  %s387_s30 = smov 8  }
 0x116   :  { %225 = dma.vmem_to_hbm [thread:$0]  %s220_s2, 256, %s423_s3, [#allocation4], %s386_s29, %s386_s29, %s387_s30  }
 0x117   :  { %376 = dma.done.wait [#allocation4], 256  }
 0x118   :  { %377 = vsyncadd [#allocation4], 4294967040 }
 0x119   :  { %229 = vsyncpa [#allocation3], 1 }
 0x11a   :  { %230 = vsyncpa [#allocation6], 1 }
 0x11b   :  { %231 = vsyncpa [#allocation4], 1 }

</bundles_post_ra>
